<compile_context>
chip_gen: v6e
topology: v6e:2x2x1
jax: 0.10.0
libtpu: 0.0.40
codegen_flags: <defaults>
</compile_context>

<pallas_src>
import functools

import jax
import jax.numpy as jnp
from jax.experimental import pallas as pl
from jax.experimental.pallas import tpu as pltpu


def _round_up(n, m):
    return (n + m - 1) // m * m


# ----------------------------------------------------------------------------
# Pallas kernel: one-hot embedding + fused/split mlp_a & mlp_c + reflection.
# ----------------------------------------------------------------------------
def ref_pm_kernel(ids_ref, x_ref, embw1_ref, wx1_ref, b1_ref,
                  whid_ref, bhid_ref, w7_ref, b7_ref, o_ref, *, fused):
    x = x_ref[...]                              # (TB, dim_x) f32, true width
    ids = ids_ref[...]                          # (TB, 1)     int32
    tb, dim_x = x.shape
    n_attr_p = embw1_ref.shape[0]
    cd = jnp.dtype(wx1_ref.dtype)               # MXU operand dtype (f32 or bf16)

    def mm(h, w):                               # f32 accumulation on the MXU
        return jnp.dot(h.astype(cd), w, preferred_element_type=jnp.float32)

    # Layer 1 with the embedding folded through [Wa1|Wc1]: one-hot is a trivial
    # K=n_attr_p contraction; fused biases (ba1+ba2 | bc1+bc2) stay f32.
    onehot = (ids == jax.lax.broadcasted_iota(jnp.int32, (tb, n_attr_p), 1))
    h = mm(onehot, embw1_ref[...]) + mm(x, wx1_ref[...]) + b1_ref[...]

    if fused:
        # Block-diagonal a|c weights: one matmul per hidden layer (2*dim_h small).
        for i in range(whid_ref.shape[0]):
            h = mm(jnp.maximum(h, 0.0), whid_ref[i]) + bhid_ref[i]
        ac = mm(jnp.maximum(h, 0.0), w7_ref[...]) + b7_ref[...]      # (TB, 2*dim_x)
        a = ac[:, :dim_x]
        c = ac[:, dim_x:]
    else:
        # Separate a / c streams: no zero off-diagonal blocks on the MXU.
        hh = whid_ref.shape[-1]                 # padded per-stream hidden width
        ha = h[:, :hh]                          # 128-aligned static slices
        hc = h[:, hh:]
        for i in range(whid_ref.shape[0] // 2):
            ha = mm(jnp.maximum(ha, 0.0), whid_ref[2 * i]) + bhid_ref[2 * i]
            hc = mm(jnp.maximum(hc, 0.0), whid_ref[2 * i + 1]) + bhid_ref[2 * i + 1]
        a = mm(jnp.maximum(ha, 0.0), w7_ref[0]) + b7_ref[0]          # (TB, dim_x)
        c = mm(jnp.maximum(hc, 0.0), w7_ref[1]) + b7_ref[1]

    # Reflection: y = x - 2 * ((x - c).a / a.a) * a   (row-wise).
    dot_aa = jnp.sum(a * a, axis=-1, keepdims=True)
    dot_xca = jnp.sum((x - c) * a, axis=-1, keepdims=True)
    # Exact divide in the f32 config (strict check); approx EUP reciprocal in bf16.
    inv = pl.reciprocal(dot_aa, approx=(cd == jnp.dtype(jnp.bfloat16)))
    o_ref[...] = x - 2.0 * (dot_xca * inv) * a


# ----------------------------------------------------------------------------
# Parameter construction (PyTorch-style: Linear weight (out, in), bias (out,)).
# ----------------------------------------------------------------------------
def make_params(key, dim_x, dim_h, n_attributes=4):
    layer_shapes = {
        "wa1": (dim_h, dim_x), "wa2": (dim_h, dim_x),
        "wa3": (dim_h, dim_h), "wa4": (dim_h, dim_h),
        "wa5": (dim_h, dim_h), "wa6": (dim_h, dim_h),
        "wa7": (dim_x, dim_h),
        "wc1": (dim_h, dim_x), "wc2": (dim_h, dim_x),
        "wc3": (dim_h, dim_h), "wc4": (dim_h, dim_h),
        "wc5": (dim_h, dim_h), "wc6": (dim_h, dim_h),
        "wc7": (dim_x, dim_h),
    }
    keys = jax.random.split(key, 2 * len(layer_shapes) + 1)
    params = {"embed_z": jax.random.normal(keys[0], (n_attributes, dim_x), jnp.float32)}
    for i, (name, shp) in enumerate(layer_shapes.items()):
        bound = 1.0 / float(shp[1]) ** 0.5
        params[name + "_w"] = jax.random.uniform(
            keys[1 + 2 * i], shp, jnp.float32, -bound, bound)
        params[name + "_b"] = jax.random.uniform(
            keys[2 + 2 * i], (shp[0],), jnp.float32, -bound, bound)
    return params


# ----------------------------------------------------------------------------
# One-time packing: transpose, fold the embedding through layer 1, fuse or split
# the a/c streams, pad to TPU-friendly (128-lane) widths.
# ----------------------------------------------------------------------------
def pack_params(params, dim_x, dim_h, n_attributes,
                compute_dtype=jnp.float32, mxu_tile=256):
    """mxu_tile: block-diagonal a|c fusion is used only while 2*dim_h <= mxu_tile
    (256 for v6e/v7x, use 128 for v5e); above that the streams are kept separate."""
    h2 = 2 * dim_h
    fused = h2 <= mxu_tile
    Ap = _round_up(n_attributes, 8)
    hi = jax.lax.Precision.HIGHEST

    def t(name):                                  # pre-transposed (in, out)
        return params[name + "_w"].T

    def b(name):
        return params[name + "_b"]

    def emb_fold(name):                           # embed @ W1^T  (pack-time fold)
        return jnp.dot(params["embed_z"], t(name), precision=hi)

    if fused:
        Hp = _round_up(h2, 128)
        ph = Hp - h2
        embw1 = jnp.pad(jnp.concatenate([emb_fold("wa1"), emb_fold("wc1")], axis=1),
                        ((0, Ap - n_attributes), (0, ph)))             # (Ap, Hp)
        wx1 = jnp.pad(jnp.concatenate([t("wa2"), t("wc2")], axis=1),
                      ((0, 0), (0, ph)))                               # (dim_x, Hp)
        b1 = jnp.pad(jnp.concatenate([b("wa1") + b("wa2"), b("wc1") + b("wc2")]),
                     (0, ph)).reshape(1, Hp)

        zhh = jnp.zeros((dim_h, dim_h), jnp.float32)

        def blockdiag(wa, wc):                                         # (Hp, Hp)
            top = jnp.concatenate([t(wa), zhh], axis=1)
            bot = jnp.concatenate([zhh, t(wc)], axis=1)
            return jnp.pad(jnp.concatenate([top, bot], axis=0), ((0, ph), (0, ph)))

        whid = jnp.stack([blockdiag(f"wa{i}", f"wc{i}") for i in range(3, 7)])
        bhid = jnp.stack([jnp.pad(jnp.concatenate([b(f"wa{i}"), b(f"wc{i}")]),
                                  (0, ph)).reshape(1, Hp) for i in range(3, 7)])

        zhx = jnp.zeros((dim_h, dim_x), jnp.float32)
        w7 = jnp.pad(jnp.concatenate(
            [jnp.concatenate([t("wa7"), zhx], axis=1),
             jnp.concatenate([zhx, t("wc7")], axis=1)], axis=0),
            ((0, ph), (0, 0)))                                         # (Hp, 2*dim_x)
        b7 = jnp.concatenate([b("wa7"), b("wc7")]).reshape(1, 2 * dim_x)
    else:
        Hh = _round_up(dim_h, 128)
        ph = Hh - dim_h

        def padc(v):                                                   # pad cols -> Hh
            return jnp.pad(v, ((0, 0), (0, ph)))

        embw1 = jnp.pad(
            jnp.concatenate([padc(emb_fold("wa1")), padc(emb_fold("wc1"))], axis=1),
            ((0, Ap - n_attributes), (0, 0)))                          # (Ap, 2*Hh)
        wx1 = jnp.concatenate([padc(t("wa2")), padc(t("wc2"))], axis=1)  # (dim_x, 2*Hh)
        b1 = jnp.concatenate([jnp.pad(b("wa1") + b("wa2"), (0, ph)),
                              jnp.pad(b("wc1") + b("wc2"), (0, ph))]).reshape(1, 2 * Hh)

        def padhh(name):                                               # (Hh, Hh)
            return jnp.pad(t(name), ((0, ph), (0, ph)))

        # interleave [a3,c3,a4,c4,...] so kernel refs stay rank-3
        whid = jnp.stack([padhh(f"w{s}{i}")
                          for i in range(3, 7) for s in ("a", "c")])   # (8, Hh, Hh)
        bhid = jnp.stack([jnp.pad(b(f"w{s}{i}"), (0, ph)).reshape(1, Hh)
                          for i in range(3, 7) for s in ("a", "c")])   # (8, 1, Hh)

        w7 = jnp.stack([jnp.pad(t("wa7"), ((0, ph), (0, 0))),
                        jnp.pad(t("wc7"), ((0, ph), (0, 0)))])         # (2, Hh, dim_x)
        b7 = jnp.stack([b("wa7").reshape(1, dim_x),
                        b("wc7").reshape(1, dim_x)])                   # (2, 1, dim_x)

    return {
        "embw1": embw1.astype(compute_dtype),
        "wx1": wx1.astype(compute_dtype),
        "b1": b1.astype(jnp.float32),           # biases stay f32 (post-MXU adds)
        "whid": whid.astype(compute_dtype),
        "bhid": bhid.astype(jnp.float32),
        "w7": w7.astype(compute_dtype),
        "b7": b7.astype(jnp.float32),
    }


# ----------------------------------------------------------------------------
# Wrapper: batch-tiled pallas_call; weights stay VMEM-resident across the grid.
# ----------------------------------------------------------------------------
@functools.partial(jax.jit, static_argnames=("block_b",))
def ref_pm_forward(packed, x, z_ids, block_b=1024):
    B, dim_x = x.shape
    fused = packed["w7"].ndim == 2              # (Hp, 2*dim_x) fused | (2,Hh,dim_x) split

    # Batch tiling: big tiles (per-grid-step overhead ~0.35us), but guarantee >= 2
    # tiles whenever the batch allows it so both v7x TensorCores get work.
    B8 = _round_up(B, 8)
    TB = max(8, min(block_b, _round_up(pl.cdiv(B8, 2), 8)))
    B_pad = _round_up(B8, TB)

    x_p = x if B_pad == B else jnp.pad(x, ((0, B_pad - B), (0, 0)))
    ids = z_ids.astype(jnp.int32).reshape(-1, 1)
    ids_p = ids if B_pad == B else jnp.pad(ids, ((0, B_pad - B), (0, 0)))

    def batch_spec(shape):
        return pl.BlockSpec(shape, lambda i: (i, 0))

    def const_spec(arr):                        # grid-constant -> DMA'd once, resident
        nd = arr.ndim
        return pl.BlockSpec(arr.shape, lambda i, _nd=nd: (0,) * _nd)

    # Generation-aware VMEM budget: 2x (double-buffered) weights + activations + IO.
    hp_width = packed["b1"].shape[1]
    w_bytes = sum(int(v.size) * v.dtype.itemsize for v in packed.values())
    act_bytes = TB * hp_width * 4 * 6                        # h / relu / matmul temps
    io_bytes = 2 * TB * (2 * dim_x * 4 + 4)                  # x + out + ids tiles, 2-buf
    needed = 2 * w_bytes + act_bytes + io_bytes + (4 << 20)
    try:
        phys = int(pltpu.get_tpu_info().vmem_capacity_bytes)
    except Exception:
        phys = 64 * 1024 * 1024                              # conservative (v7x-sized)
    vmem_limit = int(min(max(32 * 1024 * 1024, needed), int(phys * 0.8)))

    out = pl.pallas_call(
        functools.partial(ref_pm_kernel, fused=fused),
        out_shape=jax.ShapeDtypeStruct((B_pad, dim_x), jnp.float32),
        grid=(B_pad // TB,),
        in_specs=[
            batch_spec((TB, 1)),                 # attribute ids
            batch_spec((TB, dim_x)),             # x at true width (no 4x lane pad)
            const_spec(packed["embw1"]),
            const_spec(packed["wx1"]),
            const_spec(packed["b1"]),
            const_spec(packed["whid"]),
            const_spec(packed["bhid"]),
            const_spec(packed["w7"]),
            const_spec(packed["b7"]),
        ],
        out_specs=batch_spec((TB, dim_x)),       # emitted directly at dim_x width
        compiler_params=pltpu.CompilerParams(
            dimension_semantics=("parallel",),
            vmem_limit_bytes=vmem_limit,
        ),
    )(ids_p, x_p, packed["embw1"], packed["wx1"], packed["b1"],
      packed["whid"], packed["bhid"], packed["w7"], packed["b7"])

    return out if B_pad == B else out[:B]


# ----------------------------------------------------------------------------
# Pure-JAX reference (mirrors the PyTorch forward exactly) for verification.
# ----------------------------------------------------------------------------
def ref_pm_reference(params, x, z_ids):
    hp = jax.lax.Precision.HIGHEST

    def lin(h, name):
        return jnp.dot(h, params[name + "_w"].T, precision=hp) + params[name + "_b"]

    relu = jax.nn.relu
    z = params["embed_z"][z_ids]

    a = lin(z, "wa1") + lin(x, "wa2")
    for n in ("wa3", "wa4", "wa5", "wa6", "wa7"):
        a = lin(relu(a), n)
    c = lin(z, "wc1") + lin(x, "wc2")
    for n in ("wc3", "wc4", "wc5", "wc6", "wc7"):
        c = lin(relu(c), n)

    dot_aa = jnp.sum(a * a, axis=-1, keepdims=True)
    dot_xca = jnp.sum((x - c) * a, axis=-1, keepdims=True)
    return x - 2.0 * (dot_xca / dot_aa) * a


if __name__ == "__main__":
    # --- small config: fused (block-diagonal) a|c path ---------------------------
    B, dim_x, dim_h, n_attr = 8, 32, 64, 4

    key = jax.random.PRNGKey(0)
    kp, kx, kz = jax.random.split(key, 3)
    params = make_params(kp, dim_x, dim_h, n_attr)
    x = jax.random.normal(kx, (B, dim_x), jnp.float32)
    z_ids = jax.random.randint(kz, (B,), 0, n_attr)

    y_ref = ref_pm_reference(params, x, z_ids)

    # f32 MXU operands (exact-reciprocal path): strict check of the fused packing.
    packed_f32 = pack_params(params, dim_x, dim_h, n_attr, jnp.float32)
    y32 = jax.block_until_ready(ref_pm_forward(packed_f32, x, z_ids))
    assert y32.shape == (B, dim_x)
    assert jnp.allclose(y32, y_ref, atol=2e-3, rtol=2e-3), "f32 fused mismatch"

    # bf16 MXU operands (v6e/v7x fast path, approx reciprocal): loose check — bf16
    # weights through 7 layers legitimately drift; the f32 path is the strict one.
    packed_bf16 = pack_params(params, dim_x, dim_h, n_attr, jnp.bfloat16)
    y16 = jax.block_until_ready(ref_pm_forward(packed_bf16, x, z_ids))
    assert y16.shape == (B, dim_x)
    assert bool(jnp.isfinite(y16).all()), "bf16 path produced non-finite values"
    assert jnp.allclose(y16, y_ref, atol=0.25, rtol=0.25), "bf16 fused mismatch"

    # Split a/c path (2*dim_h above the MXU tile) + multi-tile grid + row padding.
    B2, dim_h2 = 20, 160
    params2 = make_params(jax.random.PRNGKey(1), dim_x, dim_h2, n_attr)
    x2 = jax.random.normal(jax.random.PRNGKey(2), (B2, dim_x), jnp.float32)
    z2 = jax.random.randint(jax.random.PRNGKey(3), (B2,), 0, n_attr)
    y_ref2 = ref_pm_reference(params2, x2, z2)
    packed2 = pack_params(params2, dim_x, dim_h2, n_attr, jnp.float32)
    y2 = jax.block_until_ready(ref_pm_forward(packed2, x2, z2))
    assert y2.shape == (B2, dim_x)
    assert jnp.allclose(y2, y_ref2, atol=2e-3, rtol=2e-3), "f32 split mismatch"

    print("KERNEL_OK")
</pallas_src>

<mosaic_0001>
module attributes {stable_mosaic.version = 11 : i64} {
  func.func @ref_pm_kernel(%arg0: i32, %arg1: memref<8x1xi32, #tpu.memory_space<vmem>>, %arg2: memref<8x32xf32, #tpu.memory_space<vmem>>, %arg3: memref<8x128xf32, #tpu.memory_space<vmem>>, %arg4: memref<32x128xf32, #tpu.memory_space<vmem>>, %arg5: memref<1x128xf32, #tpu.memory_space<vmem>>, %arg6: memref<4x128x128xf32, #tpu.memory_space<vmem>>, %arg7: memref<4x1x128xf32, #tpu.memory_space<vmem>>, %arg8: memref<128x64xf32, #tpu.memory_space<vmem>>, %arg9: memref<1x64xf32, #tpu.memory_space<vmem>>, %arg10: memref<8x32xf32, #tpu.memory_space<vmem>>) attributes {dimension_semantics = [#tpu.dimension_semantics<parallel>], iteration_bounds = array<i64: 1>, scalar_prefetch = 0 : i64, scratch_operands = 0 : i64, tpu.core_type = #tpu.core_type<tc>, window_params = [{transform_indices = @transform_0, window_bounds = array<i64: 8, 1>}, {transform_indices = @transform_1, window_bounds = array<i64: 8, 32>}, {pipeline_mode = #tpu.pipeline_mode<synchronous>, transform_indices = @transform_2, window_bounds = array<i64: 8, 128>}, {pipeline_mode = #tpu.pipeline_mode<synchronous>, transform_indices = @transform_3, window_bounds = array<i64: 32, 128>}, {pipeline_mode = #tpu.pipeline_mode<synchronous>, transform_indices = @transform_4, window_bounds = array<i64: 1, 128>}, {pipeline_mode = #tpu.pipeline_mode<synchronous>, transform_indices = @transform_5, window_bounds = array<i64: 4, 128, 128>}, {pipeline_mode = #tpu.pipeline_mode<synchronous>, transform_indices = @transform_6, window_bounds = array<i64: 4, 1, 128>}, {pipeline_mode = #tpu.pipeline_mode<synchronous>, transform_indices = @transform_7, window_bounds = array<i64: 128, 64>}, {pipeline_mode = #tpu.pipeline_mode<synchronous>, transform_indices = @transform_8, window_bounds = array<i64: 1, 64>}, {transform_indices = @transform_9, window_bounds = array<i64: 8, 32>}]} {
    %c0 = arith.constant 0 : index
    %c0_0 = arith.constant 0 : index
    %0 = vector.load %arg2[%c0, %c0_0] : memref<8x32xf32, #tpu.memory_space<vmem>>, vector<8x32xf32>
    %c0_1 = arith.constant 0 : index
    %c0_2 = arith.constant 0 : index
    %1 = vector.load %arg1[%c0_1, %c0_2] : memref<8x1xi32, #tpu.memory_space<vmem>>, vector<8x1xi32>
    %2 = tpu.iota {dimensions = array<i32: 1>} : vector<8x8xi32>
    %3 = vector.broadcast %1 : vector<8x1xi32> to vector<8x8xi32>
    %4 = arith.cmpi eq, %3, %2 : vector<8x8xi32>
    %c0_3 = arith.constant 0 : index
    %c0_4 = arith.constant 0 : index
    %5 = vector.load %arg3[%c0_3, %c0_4] : memref<8x128xf32, #tpu.memory_space<vmem>>, vector<8x128xf32>
    %6 = arith.extui %4 : vector<8x8xi1> to vector<8x8xi32>
    %7 = arith.sitofp %6 : vector<8x8xi32> to vector<8x8xf32>
    %cst = arith.constant dense<0.000000e+00> : vector<8x128xf32>
    %8 = tpu.matmul %7, %5, %cst {dimension_numbers = #tpu.dot_dimension_numbers<[1], [0], [0], [1], [0, 0, 1, 1], [], []>} : vector<8x8xf32>, vector<8x128xf32>, vector<8x128xf32> -> vector<8x128xf32>
    %c0_5 = arith.constant 0 : index
    %c0_6 = arith.constant 0 : index
    %9 = vector.load %arg4[%c0_5, %c0_6] : memref<32x128xf32, #tpu.memory_space<vmem>>, vector<32x128xf32>
    %cst_7 = arith.constant dense<0.000000e+00> : vector<8x128xf32>
    %10 = tpu.matmul %0, %9, %cst_7 {dimension_numbers = #tpu.dot_dimension_numbers<[1], [0], [0], [1], [0, 0, 1, 1], [], []>} : vector<8x32xf32>, vector<32x128xf32>, vector<8x128xf32> -> vector<8x128xf32>
    %11 = arith.addf %8, %10 : vector<8x128xf32>
    %c0_8 = arith.constant 0 : index
    %c0_9 = arith.constant 0 : index
    %12 = vector.load %arg5[%c0_8, %c0_9] : memref<1x128xf32, #tpu.memory_space<vmem>>, vector<1x128xf32>
    %13 = vector.broadcast %12 : vector<1x128xf32> to vector<8x128xf32>
    %14 = arith.addf %11, %13 : vector<8x128xf32>
    %cst_10 = arith.constant 0.000000e+00 : f32
    %15 = vector.broadcast %cst_10 : f32 to vector<8x128xf32>
    %16 = arith.maximumf %14, %15 : vector<8x128xf32>
    %c0_11 = arith.constant 0 : index
    %c0_12 = arith.constant 0 : index
    %c0_13 = arith.constant 0 : index
    %17 = vector.load %arg6[%c0_11, %c0_12, %c0_13] : memref<4x128x128xf32, #tpu.memory_space<vmem>>, vector<1x128x128xf32>
    %18 = vector.shape_cast %17 : vector<1x128x128xf32> to vector<128x128xf32>
    %cst_14 = arith.constant dense<0.000000e+00> : vector<8x128xf32>
    %19 = tpu.matmul %16, %18, %cst_14 {dimension_numbers = #tpu.dot_dimension_numbers<[1], [0], [0], [1], [0, 0, 1, 1], [], []>} : vector<8x128xf32>, vector<128x128xf32>, vector<8x128xf32> -> vector<8x128xf32>
    %c0_15 = arith.constant 0 : index
    %c0_16 = arith.constant 0 : index
    %c0_17 = arith.constant 0 : index
    %20 = vector.load %arg7[%c0_15, %c0_16, %c0_17] : memref<4x1x128xf32, #tpu.memory_space<vmem>>, vector<1x1x128xf32>
    %21 = vector.shape_cast %20 : vector<1x1x128xf32> to vector<1x128xf32>
    %22 = vector.broadcast %21 : vector<1x128xf32> to vector<8x128xf32>
    %23 = arith.addf %19, %22 : vector<8x128xf32>
    %cst_18 = arith.constant 0.000000e+00 : f32
    %24 = vector.broadcast %cst_18 : f32 to vector<8x128xf32>
    %25 = arith.maximumf %23, %24 : vector<8x128xf32>
    %c1 = arith.constant 1 : index
    %c0_19 = arith.constant 0 : index
    %c0_20 = arith.constant 0 : index
    %26 = vector.load %arg6[%c1, %c0_19, %c0_20] : memref<4x128x128xf32, #tpu.memory_space<vmem>>, vector<1x128x128xf32>
    %27 = vector.shape_cast %26 : vector<1x128x128xf32> to vector<128x128xf32>
    %cst_21 = arith.constant dense<0.000000e+00> : vector<8x128xf32>
    %28 = tpu.matmul %25, %27, %cst_21 {dimension_numbers = #tpu.dot_dimension_numbers<[1], [0], [0], [1], [0, 0, 1, 1], [], []>} : vector<8x128xf32>, vector<128x128xf32>, vector<8x128xf32> -> vector<8x128xf32>
    %c1_22 = arith.constant 1 : index
    %c0_23 = arith.constant 0 : index
    %c0_24 = arith.constant 0 : index
    %29 = vector.load %arg7[%c1_22, %c0_23, %c0_24] : memref<4x1x128xf32, #tpu.memory_space<vmem>>, vector<1x1x128xf32>
    %30 = vector.shape_cast %29 : vector<1x1x128xf32> to vector<1x128xf32>
    %31 = vector.broadcast %30 : vector<1x128xf32> to vector<8x128xf32>
    %32 = arith.addf %28, %31 : vector<8x128xf32>
    %cst_25 = arith.constant 0.000000e+00 : f32
    %33 = vector.broadcast %cst_25 : f32 to vector<8x128xf32>
    %34 = arith.maximumf %32, %33 : vector<8x128xf32>
    %c2 = arith.constant 2 : index
    %c0_26 = arith.constant 0 : index
    %c0_27 = arith.constant 0 : index
    %35 = vector.load %arg6[%c2, %c0_26, %c0_27] : memref<4x128x128xf32, #tpu.memory_space<vmem>>, vector<1x128x128xf32>
    %36 = vector.shape_cast %35 : vector<1x128x128xf32> to vector<128x128xf32>
    %cst_28 = arith.constant dense<0.000000e+00> : vector<8x128xf32>
    %37 = tpu.matmul %34, %36, %cst_28 {dimension_numbers = #tpu.dot_dimension_numbers<[1], [0], [0], [1], [0, 0, 1, 1], [], []>} : vector<8x128xf32>, vector<128x128xf32>, vector<8x128xf32> -> vector<8x128xf32>
    %c2_29 = arith.constant 2 : index
    %c0_30 = arith.constant 0 : index
    %c0_31 = arith.constant 0 : index
    %38 = vector.load %arg7[%c2_29, %c0_30, %c0_31] : memref<4x1x128xf32, #tpu.memory_space<vmem>>, vector<1x1x128xf32>
    %39 = vector.shape_cast %38 : vector<1x1x128xf32> to vector<1x128xf32>
    %40 = vector.broadcast %39 : vector<1x128xf32> to vector<8x128xf32>
    %41 = arith.addf %37, %40 : vector<8x128xf32>
    %cst_32 = arith.constant 0.000000e+00 : f32
    %42 = vector.broadcast %cst_32 : f32 to vector<8x128xf32>
    %43 = arith.maximumf %41, %42 : vector<8x128xf32>
    %c3 = arith.constant 3 : index
    %c0_33 = arith.constant 0 : index
    %c0_34 = arith.constant 0 : index
    %44 = vector.load %arg6[%c3, %c0_33, %c0_34] : memref<4x128x128xf32, #tpu.memory_space<vmem>>, vector<1x128x128xf32>
    %45 = vector.shape_cast %44 : vector<1x128x128xf32> to vector<128x128xf32>
    %cst_35 = arith.constant dense<0.000000e+00> : vector<8x128xf32>
    %46 = tpu.matmul %43, %45, %cst_35 {dimension_numbers = #tpu.dot_dimension_numbers<[1], [0], [0], [1], [0, 0, 1, 1], [], []>} : vector<8x128xf32>, vector<128x128xf32>, vector<8x128xf32> -> vector<8x128xf32>
    %c3_36 = arith.constant 3 : index
    %c0_37 = arith.constant 0 : index
    %c0_38 = arith.constant 0 : index
    %47 = vector.load %arg7[%c3_36, %c0_37, %c0_38] : memref<4x1x128xf32, #tpu.memory_space<vmem>>, vector<1x1x128xf32>
    %48 = vector.shape_cast %47 : vector<1x1x128xf32> to vector<1x128xf32>
    %49 = vector.broadcast %48 : vector<1x128xf32> to vector<8x128xf32>
    %50 = arith.addf %46, %49 : vector<8x128xf32>
    %cst_39 = arith.constant 0.000000e+00 : f32
    %51 = vector.broadcast %cst_39 : f32 to vector<8x128xf32>
    %52 = arith.maximumf %50, %51 : vector<8x128xf32>
    %c0_40 = arith.constant 0 : index
    %c0_41 = arith.constant 0 : index
    %53 = vector.load %arg8[%c0_40, %c0_41] : memref<128x64xf32, #tpu.memory_space<vmem>>, vector<128x64xf32>
    %cst_42 = arith.constant dense<0.000000e+00> : vector<8x64xf32>
    %54 = tpu.matmul %52, %53, %cst_42 {dimension_numbers = #tpu.dot_dimension_numbers<[1], [0], [0], [1], [0, 0, 1, 1], [], []>} : vector<8x128xf32>, vector<128x64xf32>, vector<8x64xf32> -> vector<8x64xf32>
    %c0_43 = arith.constant 0 : index
    %c0_44 = arith.constant 0 : index
    %55 = vector.load %arg9[%c0_43, %c0_44] : memref<1x64xf32, #tpu.memory_space<vmem>>, vector<1x64xf32>
    %56 = vector.broadcast %55 : vector<1x64xf32> to vector<8x64xf32>
    %57 = arith.addf %54, %56 : vector<8x64xf32>
    %58 = vector.extract_strided_slice %57 {offsets = [0, 0], sizes = [8, 32], strides = [1, 1]} : vector<8x64xf32> to vector<8x32xf32>
    %59 = vector.extract_strided_slice %57 {offsets = [0, 32], sizes = [8, 32], strides = [1, 1]} : vector<8x64xf32> to vector<8x32xf32>
    %60 = arith.mulf %58, %58 : vector<8x32xf32>
    %cst_45 = arith.constant dense<0.000000e+00> : vector<8xf32>
    %61 = vector.multi_reduction <add>, %60, %cst_45 [1] : vector<8x32xf32> to vector<8xf32>
    %62 = vector.shape_cast %61 : vector<8xf32> to vector<8x1xf32>
    %63 = arith.subf %0, %59 : vector<8x32xf32>
    %64 = arith.mulf %63, %58 : vector<8x32xf32>
    %cst_46 = arith.constant dense<0.000000e+00> : vector<8xf32>
    %65 = vector.multi_reduction <add>, %64, %cst_46 [1] : vector<8x32xf32> to vector<8xf32>
    %66 = vector.shape_cast %65 : vector<8xf32> to vector<8x1xf32>
    %67 = tpu.reciprocal %62 : vector<8x1xf32> -> vector<8x1xf32>
    %68 = arith.mulf %66, %67 : vector<8x1xf32>
    %cst_47 = arith.constant 2.000000e+00 : f32
    %69 = vector.broadcast %cst_47 : f32 to vector<8x1xf32>
    %70 = arith.mulf %69, %68 : vector<8x1xf32>
    %71 = vector.broadcast %70 : vector<8x1xf32> to vector<8x32xf32>
    %72 = arith.mulf %71, %58 : vector<8x32xf32>
    %73 = arith.subf %0, %72 : vector<8x32xf32>
    %c0_48 = arith.constant 0 : index
    %c0_49 = arith.constant 0 : index
    %74 = vector.load %arg10[%c0_48, %c0_49] : memref<8x32xf32, #tpu.memory_space<vmem>>, vector<8x32xf32>
    tpu.vector_store %arg10[%c0_48, %c0_49], %73 {strides = array<i32>} : memref<8x32xf32, #tpu.memory_space<vmem>>, vector<8x32xf32>,
    return
  }
  func.func @transform_0(%arg0: i32) -> (i32, i32) {
    %c0_i32 = arith.constant 0 : i32
    %c0_i32_0 = arith.constant 0 : i32
    return %arg0, %c0_i32 : i32, i32
  }
  func.func @transform_1(%arg0: i32) -> (i32, i32) {
    %c0_i32 = arith.constant 0 : i32
    %c0_i32_0 = arith.constant 0 : i32
    return %arg0, %c0_i32 : i32, i32
  }
  func.func @transform_2(%arg0: i32) -> (i32, i32) {
    %c0_i32 = arith.constant 0 : i32
    %c0_i32_0 = arith.constant 0 : i32
    %c0_i32_1 = arith.constant 0 : i32
    return %c0_i32, %c0_i32_0 : i32, i32
  }
  func.func @transform_3(%arg0: i32) -> (i32, i32) {
    %c0_i32 = arith.constant 0 : i32
    %c0_i32_0 = arith.constant 0 : i32
    %c0_i32_1 = arith.constant 0 : i32
    return %c0_i32, %c0_i32_0 : i32, i32
  }
  func.func @transform_4(%arg0: i32) -> (i32, i32) {
    %c0_i32 = arith.constant 0 : i32
    %c0_i32_0 = arith.constant 0 : i32
    %c0_i32_1 = arith.constant 0 : i32
    return %c0_i32, %c0_i32_0 : i32, i32
  }
  func.func @transform_5(%arg0: i32) -> (i32, i32, i32) {
    %c0_i32 = arith.constant 0 : i32
    %c0_i32_0 = arith.constant 0 : i32
    %c0_i32_1 = arith.constant 0 : i32
    %c0_i32_2 = arith.constant 0 : i32
    return %c0_i32, %c0_i32_0, %c0_i32_1 : i32, i32, i32
  }
  func.func @transform_6(%arg0: i32) -> (i32, i32, i32) {
    %c0_i32 = arith.constant 0 : i32
    %c0_i32_0 = arith.constant 0 : i32
    %c0_i32_1 = arith.constant 0 : i32
    %c0_i32_2 = arith.constant 0 : i32
    return %c0_i32, %c0_i32_0, %c0_i32_1 : i32, i32, i32
  }
  func.func @transform_7(%arg0: i32) -> (i32, i32) {
    %c0_i32 = arith.constant 0 : i32
    %c0_i32_0 = arith.constant 0 : i32
    %c0_i32_1 = arith.constant 0 : i32
    return %c0_i32, %c0_i32_0 : i32, i32
  }
  func.func @transform_8(%arg0: i32) -> (i32, i32) {
    %c0_i32 = arith.constant 0 : i32
    %c0_i32_0 = arith.constant 0 : i32
    %c0_i32_1 = arith.constant 0 : i32
    return %c0_i32, %c0_i32_0 : i32, i32
  }
  func.func @transform_9(%arg0: i32) -> (i32, i32) {
    %c0_i32 = arith.constant 0 : i32
    %c0_i32_0 = arith.constant 0 : i32
    return %arg0, %c0_i32 : i32, i32
  }
}

</mosaic_0001>

<bundles_post_ra>
// kernel: ref_pm_forward.1
= control target key start
LH: loop header
LB: loop body
LE: loop exit
PB: predicated region body
PF: predicated region fallthrough
CT: control target
= control target key end

     0   :  { %14 = vsyncpa [#allocation3], 0  ;;  %s1338_s0 = inlined_call_operand.vmem [shape: s32[8,1], index: 0, kind: input, shape index: {}]   ;;  %s1339_s1 = inlined_call_operand.vmem [shape: f32[8,32], index: 1, kind: input, shape index: {}]   ;;  %s1340_s2 = inlined_call_operand.vmem [shape: f32[8,128], index: 2, kind: input, shape index: {}]   ;;  %s1341_s3 = inlined_call_operand.vmem [shape: f32[32,128], index: 3, kind: input, shape index: {}]   ;;  %s1342_s4 = inlined_call_operand.vmem [shape: f32[1,128], index: 4, kind: input, shape index: {}]   ;;  %s1343_s5 = inlined_call_operand.hbm [shape: f32[4,128,128], index: 5, kind: input, shape index: {}]   ;;  %s1344_s6 = inlined_call_operand.vmem [shape: f32[4,1,128], index: 6, kind: input, shape index: {}]   ;;  %s1345_s7 = inlined_call_operand.vmem [shape: f32[128,64], index: 7, kind: input, shape index: {}]   ;;  %s1346_s8 = inlined_call_operand.vmem [shape: f32[1,64], index: 8, kind: input, shape index: {}]   ;;  %s1347_s9 = inlined_call_operand.hbm [shape: f32[8,32], index: 9, kind: output, shape index: {}]  }
   0x1   :  { %15 = vsyncpa [#allocation4], 0  ;;  %s1078_s30 = smov [#allocation2]  }
   0x2   :  { %s31_s10 = sshll.u32 %s1078_s30, 4  ;;  %s32_s10 = int_to_ptr.vmem [resolvable:$true] %s31_s10 }
   0x3   :  { %s1042_s11 = scalar_lea.vmem %s32_s10, 8192  ;;  %p1047_p1 = scmp.lt.s32.totalorder %s32_s10, %s32_s10 }
   0x4   :  { %p1043_p0 = scmp.ne.s32.totalorder %s32_s10, %s1042_s11  ;;  %p1048_p2 = scmp.lt.s32.totalorder %s1042_s11, %s1042_s11 }
   0x6   :  { %p1049_p3 = por %p1048_p2, %p1047_p1 }
   0x8   :  { %p1050_p4 = pnand %p1049_p3, %p1043_p0 }
   0xa   :  { %1053 = shalt.err (!%p1050_p4)
}
   0xb   :  { %s1079_s12 = smov 128   ;;  %s1080_s13 = smov 8  }
   0xc   :  { %37 = dma.hbm_to_vmem [thread:$0]  %s1343_s5, 8192, %s32_s10, [#allocation3], %s1079_s12, %s1079_s12, %s1080_s13  }
   0xd   :  { %1074 = dma.done.wait [#allocation3], 8192  }
   0xe   :  { %1075 = vsyncadd [#allocation3], 4294959104  ;;  %v1081_v0 = vmov 0   ;;  %v1082_v1 = vmov 0.0   ;;  %vm1083_vm0 = vmmov 0   ;;  %v48_v2 = vld [vmem:[%s1338_s0] sm:$0xff]  ;;  %v49_v21 = vlaneseq }
   0xf   :  { %1031 = vset.pattern.permute.xlu0 %v1081_v0  ;;  %832 = vmatprep.subr.mxu0 %v1082_v1  ;;  %v61_v3 = vld [vmem:[%s1341_s3 + $0x18] sm:$0xff]  ;;  %v60_v4 = vld [vmem:[%s1341_s3 + $0x10] sm:$0xff]  ;;  %v59_v5 = vld [vmem:[%s1341_s3 + $0x8] sm:$0xff]  ;;  %vm62_vm1 = vcmask 261120   ;;  %vm136_vm2 = vcmask 64512   ;;  %s1084_s19 = smov 96  }
  0x10   :  { %840 = vmatprep.mubr.msk.f32.mxu0 %vm1083_vm0, %v1082_v1  ;;  %848 = vmatprep.subr.mxu1 %v1082_v1  ;;  %v234_v6 = vld [vmem:[#allocation2 + $0x78] sm:$0xff]  ;;  %v233_v7 = vld [vmem:[#allocation2 + $0x70] sm:$0xff]  ;;  %v58_v8 = vld [vmem:[%s1341_s3] sm:$0xff]  ;;  %v50_v22 = vand.u32 127, %v49_v21 }
  0x11   :  { %880 = vmatprep.mubr.msk.f32.mxu1 %vm1083_vm0, %v1082_v1  ;;  %52 = vperm.xlu0 %1031, %v48_v2   ;;  %v232_v9 = vld [vmem:[#allocation2 + $0x68] sm:$0xff]  ;;  %v1166_v10 = vld [vmem:[%s1339_s1] sm:$0xff]  ;;  %v230_v13 = vld [vmem:[#allocation2 + $0x58] sm:$0xff] }
  0x12   :  { %833 = vmatpush3.msra.mxu0 %v61_v3  ;;  %849 = vmatpush3.msra.mxu1 %v234_v6  ;;  %v55_v11 = vld [vmem:[%s1340_s2] sm:$0xff]  ;;  %v229_v14 = vld [vmem:[#allocation2 + $0x50] sm:$0xff]  ;;  %v228_v15 = vld [vmem:[#allocation2 + $0x48] sm:$0xff] }
  0x13   :  { %834 = vmatprep.subr.mxu0 %v1082_v1  ;;  %850 = vmatprep.subr.mxu1 %v1082_v1  ;;  %v231_v12 = vld [vmem:[#allocation2 + $0x60] sm:$0xff]  ;;  %v226_v17 = vld [vmem:[#allocation2 + $0x38] sm:$0xff]  ;;  %v225_v18 = vld [vmem:[#allocation2 + $0x30] sm:$0xff] }
  0x14   :  { %835 = vmatpush3.msra.mxu0 %v60_v4  ;;  %851 = vmatpush3.msra.mxu1 %v233_v7  ;;  %v227_v16 = vld [vmem:[#allocation2 + $0x40] sm:$0xff]  ;;  %v224_v19 = vld [vmem:[#allocation2 + $0x28] sm:$0xff]  ;;  %v222_v25 = vld [vmem:[#allocation2 + $0x18] sm:$0xff] }
  0x15   :  { %836 = vmatprep.subr.mxu0 %v1082_v1  ;;  %852 = vmatprep.subr.mxu1 %v1082_v1  ;;  %v223_v20 = vld [vmem:[#allocation2 + $0x20] sm:$0xff]  ;;  %v221_v26 = vld [vmem:[#allocation2 + $0x10] sm:$0xff]  ;;  %v220_v27 = vld [vmem:[#allocation2 + $0x8] sm:$0xff] }
  0x16   :  { %837 = vmatpush3.msra.mxu0 %v59_v5  ;;  %853 = vmatpush3.msra.mxu1 %v232_v9  ;;  %v219_v28 = vld [vmem:[#allocation2] sm:$0xff]  ;;  %v329_v29 = vld [vmem:[#allocation2 + $0xf8] sm:$0xff]  ;;  %v328_v30 = vld [vmem:[#allocation2 + $0xf0] sm:$0xff] }
  0x17   :  { %838 = vmatprep.subr.mxu0 %v1082_v1  ;;  %854 = vmatprep.subr.mxu1 %v1082_v1  ;;  %v327_v32 = vld [vmem:[#allocation2 + $0xe8] sm:$0xff]  ;;  %v326_v34 = vld [vmem:[#allocation2 + $0xe0] sm:$0xff]  ;;  %v325_v35 = vld [vmem:[#allocation2 + $0xd8] sm:$0xff] }
  0x18   :  { %839 = vmatpush3.msra.mxu0 %v58_v8  ;;  %855 = vmatpush3.msra.mxu1 %v231_v12  ;;  %v324_v36 = vld [vmem:[#allocation2 + $0xd0] sm:$0xff]  ;;  %v323_v37 = vld [vmem:[#allocation2 + $0xc8] sm:$0xff]  ;;  %v322_v38 = vld [vmem:[#allocation2 + $0xc0] sm:$0xff] }
  0x19   :  { %841 = vmatmul.mubr.msk.f32.vlgmr.msra.gmra.mxu0 %vm62_vm1, %v1166_v10  ;;  %843 = vmatprep.subr.mxu0 %v1082_v1  ;;  %v321_v39 = vld [vmem:[#allocation2 + $0xb8] sm:$0xff]  ;;  %v320_v40 = vld [vmem:[#allocation2 + $0xb0] sm:$0xff]  ;;  %v319_v41 = vld [vmem:[#allocation2 + $0xa8] sm:$0xff] }
  0x1a   :  { %844 = vmatpush3.msra.mxu0 %v55_v11  ;;  %845 = vmatprep.mubr.msk.f32.mxu0 %vm1083_vm0, %v1082_v1  ;;  %v318_v42 = vld [vmem:[#allocation2 + $0xa0] sm:$0xff]  ;;  %v317_v43 = vld [vmem:[#allocation2 + $0x98] sm:$0xff]  ;;  %v316_v50 = vld [vmem:[#allocation2 + $0x90] sm:$0xff] }
  0x1b   :  { %883 = vmatprep.subr.mxu0 %v1082_v1  ;;  %856 = vmatprep.subr.mxu1 %v1082_v1  ;;  %v731_v45 = vld [vmem:[%s1342_s4] ss:$0 sm:$0xff]  ;;  %v315_v51 = vld [vmem:[#allocation2 + $0x88] sm:$0xff]  ;;  %v425_v53 = vld [vmem:[#allocation2 + $0x178] sm:$0xff] }
  0x1c   :  { %857 = vmatpush3.msra.mxu1 %v230_v13  ;;  %v314_v52 = vld [vmem:[#allocation2 + $0x80] sm:$0xff]  ;;  %v424_v54 = vld [vmem:[#allocation2 + $0x170] sm:$0xff]  ;;  %v423_v55 = vld [vmem:[#allocation2 + $0x168] sm:$0xff] }
  0x1d   :  { %858 = vmatprep.subr.mxu1 %v1082_v1  ;;  %v422_v56 = vld [vmem:[#allocation2 + $0x160] sm:$0xff]  ;;  %v421_v57 = vld [vmem:[#allocation2 + $0x158] sm:$0xff]  ;;  %v420_v58 = vld [vmem:[#allocation2 + $0x150] sm:$0xff] }
  0x1e   :  { %859 = vmatpush3.msra.mxu1 %v229_v14  ;;  %v419_v59 = vld [vmem:[#allocation2 + $0x148] sm:$0xff]  ;;  %v418_v60 = vld [vmem:[#allocation2 + $0x140] sm:$0xff]  ;;  %v417_v61 = vld [vmem:[#allocation2 + $0x138] sm:$0xff] }
  0x1f   :  { %860 = vmatprep.subr.mxu1 %v1082_v1  ;;  %v416_v62 = vld [vmem:[#allocation2 + $0x130] sm:$0xff]  ;;  %v415_v63 = vld [vmem:[#allocation2 + $0x128] sm:$0xff]  ;;  %v414_v0 = vld [vmem:[#allocation2 + $0x120] sm:$0xff] }
  0x20   :  { %861 = vmatpush3.msra.mxu1 %v228_v15  ;;  %v413_v2 = vld [vmem:[#allocation2 + $0x118] sm:$0xff]  ;;  %v732_v3 = vld [vmem:[%s1344_s6] ss:$0 sm:$0xff]  ;;  %v412_v8 = vld [vmem:[#allocation2 + $0x110] sm:$0xff] }
  0x21   :  { %862 = vmatprep.subr.mxu1 %v1082_v1  ;;  %v411_v9 = vld [vmem:[#allocation2 + $0x108] sm:$0xff]  ;;  %v410_v11 = vld [vmem:[#allocation2 + $0x100] sm:$0xff]  ;;  %v521_v12 = vld [vmem:[#allocation2 + $0x1f8] sm:$0xff] }
  0x22   :  { %863 = vmatpush3.msra.mxu1 %v227_v16  ;;  %v520_v13 = vld [vmem:[#allocation2 + $0x1f0] sm:$0xff]  ;;  %v519_v14 = vld [vmem:[#allocation2 + $0x1e8] sm:$0xff]  ;;  %v518_v15 = vld [vmem:[#allocation2 + $0x1e0] sm:$0xff] }
  0x23   :  { %864 = vmatprep.subr.mxu1 %v1082_v1  ;;  %v517_v16 = vld [vmem:[#allocation2 + $0x1d8] sm:$0xff]  ;;  %v512_v21 = vld [vmem:[#allocation2 + $0x1b0] sm:$0xff] }
  0x24   :  { %865 = vmatpush3.msra.mxu1 %v226_v17  ;;  %v516_v17 = vld [vmem:[#allocation2 + $0x1d0] sm:$0xff] }
  0x25   :  { %866 = vmatprep.subr.mxu1 %v1082_v1 }
  0x26   :  { %867 = vmatpush3.msra.mxu1 %v225_v18  ;;  %v515_v18 = vld [vmem:[#allocation2 + $0x1c8] sm:$0xff] }
  0x27   :  { %868 = vmatprep.subr.mxu1 %v1082_v1 }
  0x28   :  { %869 = vmatpush3.msra.mxu1 %v224_v19  ;;  %v514_v19 = vld [vmem:[#allocation2 + $0x1c0] sm:$0xff] }
  0x29   :  { %870 = vmatprep.subr.mxu1 %v1082_v1 }
  0x2a   :  { %871 = vmatpush3.msra.mxu1 %v223_v20  ;;  %v513_v20 = vld [vmem:[#allocation2 + $0x1b8] sm:$0xff] }
  0x2b   :  { %872 = vmatprep.subr.mxu1 %v1082_v1 }
  0x2c   :  { %873 = vmatpush3.msra.mxu1 %v222_v25  ;;  %v734_v25 = vld [vmem:[%s1344_s6 + $0x1] ss:$0 sm:$0xff] }
  0x2d   :  { %874 = vmatprep.subr.mxu1 %v1082_v1 }
  0x2e   :  { %875 = vmatpush3.msra.mxu1 %v221_v26 }
  0x2f   :  { %876 = vmatprep.subr.mxu1 %v1082_v1 }
  0x30   :  { %877 = vmatpush3.msra.mxu1 %v220_v27 }
  0x31   :  { %878 = vmatprep.subr.mxu1 %v1082_v1 }
  0x32   :  { %879 = vmatpush3.msra.mxu1 %v219_v28 }
  0x33   :  { %918 = vmatprep.subr.mxu1 %v1082_v1 }
  0x8c   :  { %v53_v23 = vpop.permute.xlu0 %52 }
  0x8d   :  { %vm54_vm3 = vcmp.eq.s32.totalorder %v53_v23, %v50_v22  ;;  %v511_v22 = vld [vmem:[#allocation2 + $0x1a8] sm:$0xff]  ;;  %v510_v23 = vld [vmem:[#allocation2 + $0x1a0] sm:$0xff] }
  0x8e   :  { %v728_v24 = vsel %vm54_vm3, 1.0, %v1082_v1 }
  0x8f   :  { %846 = vmatmul.mubr.msk.f32.vlgmr.msra.gmra.mxu0 %vm136_vm2, %v728_v24  ;;  %v509_v24 = vld [vmem:[#allocation2 + $0x198] sm:$0xff] }
  0x90   :  { %915 = vmatprep.mubr.msk.f32.mxu0 %vm1083_vm0, %v1082_v1  ;;  %884 = vmatpush3.msra.mxu0 %v329_v29 }
  0x91   :  { %885 = vmatprep.subr.mxu0 %v1082_v1 }
  0x92   :  { %886 = vmatpush3.msra.mxu0 %v328_v30  ;;  %v508_v30 = vld [vmem:[#allocation2 + $0x190] sm:$0xff] }
  0x93   :  { %887 = vmatprep.subr.mxu0 %v1082_v1 }
  0x94   :  { %888 = vmatpush3.msra.mxu0 %v327_v32  ;;  %v506_v32 = vld [vmem:[#allocation2 + $0x180] sm:$0xff] }
  0x95   :  { %889 = vmatprep.subr.mxu0 %v1082_v1 }
  0x96   :  { %890 = vmatpush3.msra.mxu0 %v326_v34  ;;  %v615_v34 = vld [vmem:[%s1345_s7 + $0x70] sm:$0xff] }
  0x97   :  { %891 = vmatprep.subr.mxu0 %v1082_v1 }
  0x98   :  { %892 = vmatpush3.msra.mxu0 %v325_v35  ;;  %v614_v35 = vld [vmem:[%s1345_s7 + $0x68] sm:$0xff] }
  0x99   :  { %893 = vmatprep.subr.mxu0 %v1082_v1 }
  0x9a   :  { %894 = vmatpush3.msra.mxu0 %v324_v36  ;;  %v613_v36 = vld [vmem:[%s1345_s7 + $0x60] sm:$0xff] }
  0x9b   :  { %895 = vmatprep.subr.mxu0 %v1082_v1 }
  0x9c   :  { %896 = vmatpush3.msra.mxu0 %v323_v37  ;;  %v612_v37 = vld [vmem:[%s1345_s7 + $0x58] sm:$0xff] }
  0x9d   :  { %897 = vmatprep.subr.mxu0 %v1082_v1 }
  0x9e   :  { %898 = vmatpush3.msra.mxu0 %v322_v38  ;;  %v611_v38 = vld [vmem:[%s1345_s7 + $0x50] sm:$0xff] }
  0x9f   :  { %899 = vmatprep.subr.mxu0 %v1082_v1 }
  0xa0   :  { %900 = vmatpush3.msra.mxu0 %v321_v39  ;;  %v610_v39 = vld [vmem:[%s1345_s7 + $0x48] sm:$0xff] }
  0xa1   :  { %901 = vmatprep.subr.mxu0 %v1082_v1 }
  0xa2   :  { %902 = vmatpush3.msra.mxu0 %v320_v40  ;;  %v609_v40 = vld [vmem:[%s1345_s7 + $0x40] sm:$0xff] }
  0xa3   :  { %903 = vmatprep.subr.mxu0 %v1082_v1 }
  0xa4   :  { %904 = vmatpush3.msra.mxu0 %v319_v41  ;;  %v608_v41 = vld [vmem:[%s1345_s7 + $0x38] sm:$0xff] }
  0xa5   :  { %905 = vmatprep.subr.mxu0 %v1082_v1 }
  0xa6   :  { %906 = vmatpush3.msra.mxu0 %v318_v42  ;;  %v607_v42 = vld [vmem:[%s1345_s7 + $0x30] sm:$0xff] }
  0xa7   :  { %907 = vmatprep.subr.mxu0 %v1082_v1 }
  0xa8   :  { %908 = vmatpush3.msra.mxu0 %v317_v43  ;;  %v606_v43 = vld [vmem:[%s1345_s7 + $0x28] sm:$0xff] }
  0xa9   :  { %909 = vmatprep.subr.mxu0 %v1082_v1 }
  0xaa   :  { %910 = vmatpush3.msra.mxu0 %v316_v50 }
  0xab   :  { %911 = vmatprep.subr.mxu0 %v1082_v1 }
  0xac   :  { %912 = vmatpush3.msra.mxu0 %v315_v51  ;;  %v603_v51 = vld [vmem:[%s1345_s7 + $0x10] sm:$0xff] }
  0xad   :  { %913 = vmatprep.subr.mxu0 %v1082_v1 }
  0xae   :  { %914 = vmatpush3.msra.mxu0 %v314_v52  ;;  %v602_v52 = vld [vmem:[%s1345_s7 + $0x8] sm:$0xff] }
  0xaf   :  { %953 = vmatprep.subr.mxu0 %v1082_v1 }
  0xd9   :  { %v132_v31 = vpop.f32.mrf.mxu0 }
  0xdb   :  { %v842_v33 = vpop.f32.mrf.mxu0 }
  0xdc   :  { %v616_v33 = vld [vmem:[%s1345_s7 + $0x78] sm:$0xff] }
 0x14f   :  { %v206_v44 = vpop.f32.mrf.mxu0 }
 0x150   :  { %v207_v46 = vadd.f32 %v206_v44, %v132_v31  ;;  %v507_v31 = vld [vmem:[#allocation2 + $0x188] sm:$0xff]  ;;  %v605_v44 = vld [vmem:[%s1345_s7 + $0x20] sm:$0xff] }
 0x151   :  { %v847_v47 = vpop.f32.mrf.mxu0 }
 0x152   :  { %v217_v48 = vadd.f32 %v731_v45, %v207_v46  ;;  %v604_v45 = vld [vmem:[%s1345_s7 + $0x18] sm:$0xff]  ;;  %v736_v46 = vld [vmem:[%s1344_s6 + $0x2] ss:$0 sm:$0xff] }
 0x154   :  { %v218_v49 = vmax.f32 %v217_v48, 0.0 }
 0x156   :  { %881 = vmatmul.mubr.f32.vlgmr.msra.gmra.mxu1 %v218_v49 }
 0x157   :  { %950 = vmatprep.mubr.msk.f32.mxu1 %vm1083_vm0, %v1082_v1  ;;  %919 = vmatpush3.msra.mxu1 %v425_v53  ;;  %v601_v53 = vld [vmem:[%s1345_s7] sm:$0xff] }
 0x158   :  { %920 = vmatprep.subr.mxu1 %v1082_v1 }
 0x159   :  { %921 = vmatpush3.msra.mxu1 %v424_v54  ;;  %v738_v54 = vld [vmem:[%s1344_s6 + $0x3] ss:$0 sm:$0xff]  ;;  %s1085_s6 = smov [#allocation5]  }
 0x15a   :  { %922 = vmatprep.subr.mxu1 %v1082_v1  ;;  %s719_s7 = sshll.u32 %s1085_s6, 4  ;;  %s720_s7 = int_to_ptr.vmem [resolvable:$true] %s719_s7 }
 0x15b   :  { %923 = vmatpush3.msra.mxu1 %v423_v55  ;;  %p1059_p6 = scmp.lt.s32.totalorder %s720_s7, %s720_s7 }
 0x15c   :  { %924 = vmatprep.subr.mxu1 %v1082_v1 }
 0x15d   :  { %925 = vmatpush3.msra.mxu1 %v422_v56 }
 0x15e   :  { %926 = vmatprep.subr.mxu1 %v1082_v1 }
 0x15f   :  { %927 = vmatpush3.msra.mxu1 %v421_v57 }
 0x160   :  { %928 = vmatprep.subr.mxu1 %v1082_v1 }
 0x161   :  { %929 = vmatpush3.msra.mxu1 %v420_v58 }
 0x162   :  { %930 = vmatprep.subr.mxu1 %v1082_v1 }
 0x163   :  { %931 = vmatpush3.msra.mxu1 %v419_v59  ;;  %v739_v59 = vld [vmem:[%s1346_s8] ss:$0 sm:$0xff]  ;;  %s1054_s8 = scalar_lea.vmem %s720_s7, 128 }
 0x164   :  { %932 = vmatprep.subr.mxu1 %v1082_v1  ;;  %p1055_p5 = scmp.ne.s32.totalorder %s720_s7, %s1054_s8  ;;  %p1060_p7 = scmp.lt.s32.totalorder %s1054_s8, %s1054_s8 }
 0x165   :  { %933 = vmatpush3.msra.mxu1 %v418_v60 }
 0x166   :  { %934 = vmatprep.subr.mxu1 %v1082_v1  ;;  %p1061_p8 = por %p1060_p7, %p1059_p6 }
 0x167   :  { %935 = vmatpush3.msra.mxu1 %v417_v61 }
 0x168   :  { %936 = vmatprep.subr.mxu1 %v1082_v1  ;;  %p1062_p9 = pnand %p1061_p8, %p1055_p5 }
 0x169   :  { %937 = vmatpush3.msra.mxu1 %v416_v62 }
 0x16a   :  { %938 = vmatprep.subr.mxu1 %v1082_v1 }
 0x16b   :  { %939 = vmatpush3.msra.mxu1 %v415_v63 }
 0x16c   :  { %940 = vmatprep.subr.mxu1 %v1082_v1 }
 0x16d   :  { %941 = vmatpush3.msra.mxu1 %v414_v0 }
 0x16e   :  { %942 = vmatprep.subr.mxu1 %v1082_v1 }
 0x16f   :  { %943 = vmatpush3.msra.mxu1 %v413_v2 }
 0x170   :  { %944 = vmatprep.subr.mxu1 %v1082_v1 }
 0x171   :  { %945 = vmatpush3.msra.mxu1 %v412_v8 }
 0x172   :  { %946 = vmatprep.subr.mxu1 %v1082_v1 }
 0x173   :  { %947 = vmatpush3.msra.mxu1 %v411_v9 }
 0x174   :  { %948 = vmatprep.subr.mxu1 %v1082_v1 }
 0x175   :  { %949 = vmatpush3.msra.mxu1 %v410_v11 }
 0x176   :  { %988 = vmatprep.subr.mxu1 %v1082_v1 }
 0x216   :  { %v308_v4 = vpop.f32.mrf.mxu1 }
 0x217   :  { %v309_v5 = vadd.f32 %v732_v3, %v308_v4 }
 0x218   :  { %v882_v6 = vpop.f32.mrf.mxu1 }
 0x219   :  { %v312_v7 = vmax.f32 %v309_v5, 0.0 }
 0x21b   :  { %916 = vmatmul.mubr.f32.vlgmr.msra.gmra.mxu0 %v312_v7 }
 0x21c   :  { %985 = vmatprep.mubr.msk.f32.mxu0 %vm1083_vm0, %v1082_v1  ;;  %954 = vmatpush3.msra.mxu0 %v521_v12 }
 0x21d   :  { %955 = vmatprep.subr.mxu0 %v1082_v1 }
 0x21e   :  { %956 = vmatpush3.msra.mxu0 %v520_v13 }
 0x21f   :  { %957 = vmatprep.subr.mxu0 %v1082_v1 }
 0x220   :  { %958 = vmatpush3.msra.mxu0 %v519_v14 }
 0x221   :  { %959 = vmatprep.subr.mxu0 %v1082_v1 }
 0x222   :  { %960 = vmatpush3.msra.mxu0 %v518_v15 }
 0x223   :  { %961 = vmatprep.subr.mxu0 %v1082_v1 }
 0x224   :  { %962 = vmatpush3.msra.mxu0 %v517_v16 }
 0x225   :  { %963 = vmatprep.subr.mxu0 %v1082_v1 }
 0x226   :  { %964 = vmatpush3.msra.mxu0 %v516_v17 }
 0x227   :  { %965 = vmatprep.subr.mxu0 %v1082_v1 }
 0x228   :  { %966 = vmatpush3.msra.mxu0 %v515_v18 }
 0x229   :  { %967 = vmatprep.subr.mxu0 %v1082_v1 }
 0x22a   :  { %968 = vmatpush3.msra.mxu0 %v514_v19 }
 0x22b   :  { %969 = vmatprep.subr.mxu0 %v1082_v1 }
 0x22c   :  { %970 = vmatpush3.msra.mxu0 %v513_v20 }
 0x22d   :  { %971 = vmatprep.subr.mxu0 %v1082_v1 }
 0x22e   :  { %972 = vmatpush3.msra.mxu0 %v512_v21 }
 0x22f   :  { %973 = vmatprep.subr.mxu0 %v1082_v1 }
 0x230   :  { %974 = vmatpush3.msra.mxu0 %v511_v22 }
 0x231   :  { %975 = vmatprep.subr.mxu0 %v1082_v1 }
 0x232   :  { %976 = vmatpush3.msra.mxu0 %v510_v23 }
 0x233   :  { %977 = vmatprep.subr.mxu0 %v1082_v1 }
 0x234   :  { %978 = vmatpush3.msra.mxu0 %v509_v24 }
 0x235   :  { %979 = vmatprep.subr.mxu0 %v1082_v1 }
 0x236   :  { %980 = vmatpush3.msra.mxu0 %v508_v30 }
 0x237   :  { %981 = vmatprep.subr.mxu0 %v1082_v1 }
 0x238   :  { %982 = vmatpush3.msra.mxu0 %v507_v31 }
 0x239   :  { %983 = vmatprep.subr.mxu0 %v1082_v1 }
 0x23a   :  { %984 = vmatpush3.msra.mxu0 %v506_v32 }
 0x2db   :  { %v404_v26 = vpop.f32.mrf.mxu0 }
 0x2dc   :  { %v405_v27 = vadd.f32 %v734_v25, %v404_v26 }
 0x2dd   :  { %v917_v28 = vpop.f32.mrf.mxu0 }
 0x2de   :  { %v408_v29 = vmax.f32 %v405_v27, 0.0 }
 0x2e0   :  { %951 = vmatmul.mubr.f32.vlgmr.msra.gmra.mxu1 %v408_v29 }
 0x2e1   :  { %1020 = vmatprep.mubr.msk.f32.mxu1 %vm1083_vm0, %v1082_v1  ;;  %989 = vmatpush3.msra.mxu1 %v616_v33 }
 0x2e2   :  { %990 = vmatprep.subr.mxu1 %v1082_v1 }
 0x2e3   :  { %991 = vmatpush3.msra.mxu1 %v615_v34 }
 0x2e4   :  { %992 = vmatprep.subr.mxu1 %v1082_v1 }
 0x2e5   :  { %993 = vmatpush3.msra.mxu1 %v614_v35 }
 0x2e6   :  { %994 = vmatprep.subr.mxu1 %v1082_v1 }
 0x2e7   :  { %995 = vmatpush3.msra.mxu1 %v613_v36 }
 0x2e8   :  { %996 = vmatprep.subr.mxu1 %v1082_v1 }
 0x2e9   :  { %997 = vmatpush3.msra.mxu1 %v612_v37 }
 0x2ea   :  { %998 = vmatprep.subr.mxu1 %v1082_v1 }
 0x2eb   :  { %999 = vmatpush3.msra.mxu1 %v611_v38 }
 0x2ec   :  { %1000 = vmatprep.subr.mxu1 %v1082_v1 }
 0x2ed   :  { %1001 = vmatpush3.msra.mxu1 %v610_v39 }
 0x2ee   :  { %1002 = vmatprep.subr.mxu1 %v1082_v1 }
 0x2ef   :  { %1003 = vmatpush3.msra.mxu1 %v609_v40 }
 0x2f0   :  { %1004 = vmatprep.subr.mxu1 %v1082_v1 }
 0x2f1   :  { %1005 = vmatpush3.msra.mxu1 %v608_v41 }
 0x2f2   :  { %1006 = vmatprep.subr.mxu1 %v1082_v1 }
 0x2f3   :  { %1007 = vmatpush3.msra.mxu1 %v607_v42 }
 0x2f4   :  { %1008 = vmatprep.subr.mxu1 %v1082_v1 }
 0x2f5   :  { %1009 = vmatpush3.msra.mxu1 %v606_v43 }
 0x2f6   :  { %1010 = vmatprep.subr.mxu1 %v1082_v1 }
 0x2f7   :  { %1011 = vmatpush3.msra.mxu1 %v605_v44 }
 0x2f8   :  { %1012 = vmatprep.subr.mxu1 %v1082_v1 }
 0x2f9   :  { %1013 = vmatpush3.msra.mxu1 %v604_v45 }
 0x2fa   :  { %1014 = vmatprep.subr.mxu1 %v1082_v1 }
 0x2fb   :  { %1015 = vmatpush3.msra.mxu1 %v603_v51 }
 0x2fc   :  { %1016 = vmatprep.subr.mxu1 %v1082_v1 }
 0x2fd   :  { %1017 = vmatpush3.msra.mxu1 %v602_v52 }
 0x2fe   :  { %1018 = vmatprep.subr.mxu1 %v1082_v1 }
 0x2ff   :  { %1019 = vmatpush3.msra.mxu1 %v601_v53 }
 0x3a0   :  { %v500_v47 = vpop.f32.mrf.mxu1 }
 0x3a1   :  { %v501_v48 = vadd.f32 %v736_v46, %v500_v47 }
 0x3a2   :  { %v952_v49 = vpop.f32.mrf.mxu1 }
 0x3a3   :  { %v504_v50 = vmax.f32 %v501_v48, 0.0 }
 0x3a5   :  { %986 = vmatmul.mubr.f32.vlgmr.msra.gmra.mxu0 %v504_v50 }
 0x465   :  { %v596_v55 = vpop.f32.mrf.mxu0 }
 0x466   :  { %v597_v56 = vadd.f32 %v738_v54, %v596_v55 }
 0x467   :  { %v987_v57 = vpop.f32.mrf.mxu0 }
 0x468   :  { %v600_v58 = vmax.f32 %v597_v56, 0.0 }
 0x46a   :  { %1021 = vmatmul.mubr.f32.vlgmr.msra.gmra.mxu1 %v600_v58 }
 0x52a   :  { %v690_v60 = vpop.f32.mrf.mxu1 }
 0x52b   :  { %v691_v1 = vadd.f32 %v739_v59, %v690_v60 }
 0x52c   :  { %v1022_v61 = vpop.f32.mrf.mxu1 }
 0x52d   :  { %699 = vrot.lane.b32.xlu0 %v691_v1, %s1084_s19  ;;  %v694_v62 = vmul.f32 %v691_v1, %v691_v1 }
 0x52f   :  { %v695_v63 = vsel %vm62_vm1, %v694_v62, 0.0 }
 0x530   :  { %696 = vadd.xlane.f32.xlu1 %v695_v63 }
 0x59f   :  { %v700_v0 = vpop.permute.xlu0 %699 }
 0x5a0   :  { %v702_v2 = vsub.f32 %v1166_v10, %v700_v0 }
 0x5a2   :  { %v703_v3 = vmul.f32 %v702_v2, %v691_v1 }
 0x5a4   :  { %v704_v4 = vsel %vm62_vm1, %v703_v3, 0.0 }
 0x5a5   :  { %705 = vadd.xlane.f32.xlu1 %v704_v4 }
 0x5b9   :  { %v697_v5 = vpop.xlane.xlu1 %696 }
 0x5ba   :  { %1032 = vrcp.f32 %v697_v5 }
 0x5c7   :  { %v1033_v6 = vpop.eup %1032 }
 0x62e   :  { %v706_v7 = vpop.xlane.xlu1 %705 }
 0x62f   :  { %v708_v8 = vmul.f32 %v1033_v6, %v706_v7 }
 0x631   :  { %v709_v9 = vmul.f32 2.0, %v708_v8 }
 0x633   :  { %v710_v11 = vmul.f32 %v709_v9, %v691_v1 }
 0x635   :  { %v711_v12 = vsub.f32 %v1166_v10, %v710_v11 }
 0x637   :  { %712 = vst.msk [vmem:[#allocation5] sm:$0xff] %vm62_vm1, %v711_v12 }
 0x638   :  { %1065 = shalt.err (!%p1062_p9)
}
 0x639   :  { %722 = dma.vmem_to_hbm [thread:$0]  %s720_s7, 128, %s1347_s9, [#allocation4]  }
 0x63a   :  { %1076 = dma.done.wait [#allocation4], 128  }
 0x63b   :  { %1077 = vsyncadd [#allocation4], 4294967168 }
 0x63c   :  { %726 = vsyncpa [#allocation3], 1 }
 0x63d   :  { %727 = vsyncpa [#allocation4], 1 }

</bundles_post_ra>
